<compile_context>
chip_gen: v7x
topology: tpu7x:2x2x1
jax: 0.10.0
libtpu: 0.0.40
codegen_flags: <defaults>
</compile_context>

<pallas_src>
import jax
import jax.numpy as jnp
from jax.experimental import pallas as pl
from jax.experimental.pallas import tpu as pltpu

LN_EPS = 1e-5
_HIGHEST = jax.lax.Precision.HIGHEST


# --------------------------------------------------------------------------------------
# Stage 1: per-node projections  (B, N, d_in) -> left_proj / right_proj  (B, N, d_out)
# --------------------------------------------------------------------------------------
def _proj_kernel(x_ref, nmask_ref, gamma_ref, beta_ref,
                 wlc_ref, blc_ref, wrc_ref, brc_ref, be_ref,
                 lp_ref, rp_ref):
    x = x_ref[0]                                              # (TP, d_in) f32

    # LayerNorm (biased variance, eps=1e-5: matches nn.LayerNorm).
    mean = jnp.mean(x, axis=-1, keepdims=True)
    xc = x - mean
    var = jnp.mean(xc * xc, axis=-1, keepdims=True)
    xn = xc * jax.lax.rsqrt(var + LN_EPS)
    xn = xn * gamma_ref[...] + beta_ref[...]

    # Fused per-side projection straight to d_out.  Weights may be bf16 (v6e/v7x native
    # MXU path); accumulation is always f32.
    xn_c = xn.astype(wlc_ref.dtype)
    left = jnp.dot(xn_c, wlc_ref[...], preferred_element_type=jnp.float32) + blc_ref[...]
    right = jnp.dot(xn_c, wrc_ref[...], preferred_element_type=jnp.float32) + brc_ref[...]

    # Node mask (masked_fill(~mask, 0)) as a multiply by {0,1}.  The per-row scalar mask
    # commutes through the fused projection, so this matches the reference ordering.
    m = nmask_ref[0]                                          # (TP, 1) f32 in {0, 1}
    lp_ref[0] = (left * m).astype(lp_ref.dtype)
    # Edge bias `be` is folded exactly once into right_proj and is NOT node-masked
    # (the reference adds it after edge_lin unconditionally).
    rp_ref[0] = (right * m + be_ref[...]).astype(rp_ref.dtype)


# --------------------------------------------------------------------------------------
# Stage 2: tiled (N, N) plane:  e[b, i, j] = right_proj[b, i] + left_proj[b, j], edge-masked
# --------------------------------------------------------------------------------------
def _edge_kernel(lp_ref, rp_ref, emask_ref, out_ref):
    lp = lp_ref[0]                                            # (TJ, d_out)  varies with j
    rp = rp_ref[0]                                            # (TI, d_out)  varies with i
    # Mask as a multiply (1 VPU op/elem) instead of compare+select (perf-review item).
    em = emask_ref[0].astype(jnp.float32).astype(lp.dtype)    # (TI, TJ) in {0, 1}
    e = (rp[:, None, :] + lp[None, :, :]) * em[:, :, None]    # pure VPU broadcast-add
    out_ref[0] = e.astype(out_ref.dtype)


# --------------------------------------------------------------------------------------
# Helpers
# --------------------------------------------------------------------------------------
def _pick_tile(n, cap, multiple):
    """Largest divisor of n that is a multiple of `multiple` and <= cap; falls back to n."""
    t = (min(cap, n) // multiple) * multiple
    while t >= multiple:
        if n % t == 0:
            return t
        t -= multiple
    return n


def _vmem_capacity_bytes():
    """Physical VMEM per core; conservative (v7x) fallback if the query is unavailable."""
    try:
        cap = int(pltpu.get_tpu_info().vmem_capacity_bytes)
        if cap >= (48 << 20):
            return cap
    except Exception:
        pass
    return 64 << 20


# --------------------------------------------------------------------------------------
# Wrapper
# --------------------------------------------------------------------------------------
def node_product(node_features, node_mask, edge_mask, params, out_dtype=jnp.bfloat16):
    """NodeProduct forward.

    node_features: (B, N, d_in) f32; node_mask: (B, N) bool; edge_mask: (B, N, N) bool.

    out_dtype: bfloat16 by default -- the kernel is HBM-writeback bound and bf16 halves
    the dominant output traffic on all generations (and VMEM per tile on v7x).
    Pass jnp.float32 for bit-level parity with the PyTorch module.
    """
    B, N, d_in = node_features.shape
    d_out = params["be"].shape[-1]
    out_dtype = jnp.dtype(out_dtype)
    out_itemsize = out_dtype.itemsize

    # Stage-2 compute / stage-1 output dtype.  bf16 compute only pays on v6e/v7x (packed
    # VPU) but is numerically safe everywhere, so key it off the requested output dtype.
    compute_dtype = jnp.bfloat16 if out_dtype == jnp.dtype(jnp.bfloat16) else jnp.float32
    compute_itemsize = jnp.dtype(compute_dtype).itemsize

    # ---- parameter glue (tiny; one-time XLA work at HIGHEST matmul precision) ----
    gamma = params["ln_gamma"].reshape(1, d_in)
    beta = params["ln_beta"].reshape(1, d_in)
    weT = params["we"].T                         # (2*d_in, d_out)
    weL, weR = weT[:d_in], weT[d_in:]            # cat order: [left (varies j), right (varies i)]
    # Fuse chained per-side matmuls:  (xn @ Wl^T + bl) @ WeL == xn @ (Wl^T @ WeL) + bl @ WeL
    wl_c = jnp.matmul(params["wl"].T, weL, precision=_HIGHEST)          # (d_in, d_out)
    wr_c = jnp.matmul(params["wr"].T, weR, precision=_HIGHEST)
    bl_c = jnp.matmul(params["bl"][None, :], weL, precision=_HIGHEST)   # (1, d_out)
    br_c = jnp.matmul(params["br"][None, :], weR, precision=_HIGHEST)
    be = params["be"].reshape(1, d_out).astype(jnp.float32)
    if compute_dtype == jnp.bfloat16:
        wl_c = wl_c.astype(jnp.bfloat16)         # native bf16 MXU on v6e/v7x
        wr_c = wr_c.astype(jnp.bfloat16)
    nmask_f = node_mask.astype(jnp.float32).reshape(B, N, 1)
    emask_i8 = edge_mask.astype(jnp.int8)        # 4x less mask read traffic than f32

    # ---- stage 1: per-node fused projections, grid (B, N/TP) ----
    TP = _pick_tile(N, 512, 8)                   # big M tile: K=d_in underfills the MXU
    const = lambda shape: pl.BlockSpec(shape, lambda b, n: (0,) * len(shape))
    # NOTE: invariant weight blocks are tiny (d_in*d_out); pl.Buffered(1) would save their
    # double-buffer VMEM but only matters at AlphaFold-scale d_in, so it is intentionally
    # skipped here to keep lowering simple.
    lp, rp = pl.pallas_call(
        _proj_kernel,
        out_shape=(jax.ShapeDtypeStruct((B, N, d_out), compute_dtype),
                   jax.ShapeDtypeStruct((B, N, d_out), compute_dtype)),
        grid_spec=pltpu.PrefetchScalarGridSpec(
            num_scalar_prefetch=0,
            grid=(B, N // TP),
            in_specs=[
                pl.BlockSpec((1, TP, d_in), lambda b, n: (b, n, 0)),    # node features
                pl.BlockSpec((1, TP, 1), lambda b, n: (b, n, 0)),       # node mask (f32 0/1)
                const((1, d_in)), const((1, d_in)),                     # ln gamma, beta
                const((d_in, d_out)), const((1, d_out)),                # Wl_c, bl_c
                const((d_in, d_out)), const((1, d_out)),                # Wr_c, br_c
                const((1, d_out)),                                      # be
            ],
            out_specs=[
                pl.BlockSpec((1, TP, d_out), lambda b, n: (b, n, 0)),
                pl.BlockSpec((1, TP, d_out), lambda b, n: (b, n, 0)),
            ],
        ),
        compiler_params=pltpu.CompilerParams(
            dimension_semantics=("parallel", "parallel")),
    )(node_features, nmask_f, gamma, beta, wl_c, bl_c, wr_c, br_c, be)

    # ---- stage 2: tiled broadcast-add over the (N, N) edge plane ----
    vmem_cap = _vmem_capacity_bytes()
    usable = vmem_cap - (16 << 20)               # headroom for compiler-internal scratch
    if usable >= (96 << 20):                     # v5e / v6e: 128 MiB physical VMEM
        out_budget = 24 << 20                    # fewer, larger tiles amortize ~0.35us/step
    else:                                        # v7x: 64 MiB physical VMEM
        out_budget = (16 << 20) if out_itemsize <= 2 else (8 << 20)

    TJ = _pick_tile(N, 128, 128)                 # mask block last dim: multiple of 128 or N
    ti_cap = max(8, out_budget // (TJ * d_out * out_itemsize))
    TI = _pick_tile(N, min(512, ti_cap), 8)
    # Megacore balance (v7x): avoid an odd number of i-steps when B cannot be split evenly.
    if B % 2 == 1 and (N // TI) % 2 == 1 and TI % 16 == 0:
        TI //= 2

    def _stage2_vmem(ti, tj):
        out_t = ti * tj * d_out * out_itemsize
        lp_t = tj * d_out * compute_itemsize
        rp_t = ti * d_out * compute_itemsize
        mk_t = ti * tj                                   # int8
        inter = ti * tj * d_out * compute_itemsize       # broadcast-add intermediate
        return 2 * (out_t + lp_t + rp_t + mk_t) + inter  # double-buffered I/O + intermediate

    needed = _stage2_vmem(TI, TJ)
    while needed + (8 << 20) > usable and TI % 16 == 0:
        TI //= 2
        needed = _stage2_vmem(TI, TJ)
    vmem_limit = int(min(max(needed + (8 << 20), 32 << 20), usable))

    out = pl.pallas_call(
        _edge_kernel,
        out_shape=jax.ShapeDtypeStruct((B, N, N, d_out), out_dtype),
        grid_spec=pltpu.PrefetchScalarGridSpec(
            num_scalar_prefetch=0,
            grid=(B, N // TI, N // TJ),
            in_specs=[
                pl.BlockSpec((1, TJ, d_out), lambda b, i, j: (b, j, 0)),   # left_proj  (cols j)
                pl.BlockSpec((1, TI, d_out), lambda b, i, j: (b, i, 0)),   # right_proj (rows i)
                pl.BlockSpec((1, TI, TJ), lambda b, i, j: (b, i, j)),      # edge mask (int8)
            ],
            out_specs=pl.BlockSpec((1, TI, TJ, d_out), lambda b, i, j: (b, i, j, 0)),
        ),
        compiler_params=pltpu.CompilerParams(
            dimension_semantics=("parallel", "parallel", "parallel"),
            vmem_limit_bytes=vmem_limit),
    )(lp, rp, emask_i8)
    return out


def node_product_reference(node_features, node_mask, edge_mask, params):
    """Pure-JAX mirror of the PyTorch forward (HIGHEST precision => true f32 reference)."""
    B, N, d_in = node_features.shape
    mean = jnp.mean(node_features, axis=-1, keepdims=True)
    var = jnp.mean((node_features - mean) ** 2, axis=-1, keepdims=True)
    xn = (node_features - mean) / jnp.sqrt(var + LN_EPS)
    xn = xn * params["ln_gamma"] + params["ln_beta"]
    left = jnp.matmul(xn, params["wl"].T, precision=_HIGHEST) + params["bl"]
    right = jnp.matmul(xn, params["wr"].T, precision=_HIGHEST) + params["br"]
    nm = node_mask[:, :, None]
    left = jnp.where(nm, left, 0.0)
    right = jnp.where(nm, right, 0.0)
    left_b = jnp.broadcast_to(left[:, None, :, :], (B, N, N, d_in))
    right_b = jnp.broadcast_to(right[:, :, None, :], (B, N, N, d_in))
    cat = jnp.concatenate([left_b, right_b], axis=-1)
    e = jnp.matmul(cat, params["we"].T, precision=_HIGHEST) + params["be"]
    return jnp.where(edge_mask[:, :, :, None], e, 0.0)


if __name__ == "__main__":
    # d_out=128 (pair-embedding width) keeps output stores lane-dense.
    B, N, d_in, d_out = 2, 32, 32, 128

    key = jax.random.PRNGKey(0)
    ks = jax.random.split(key, 11)

    params = {
        "ln_gamma": 1.0 + 0.1 * jax.random.normal(ks[0], (d_in,), jnp.float32),
        "ln_beta": 0.1 * jax.random.normal(ks[1], (d_in,), jnp.float32),
        "wl": jax.random.normal(ks[2], (d_in, d_in), jnp.float32) * 0.1,
        "bl": jax.random.normal(ks[3], (d_in,), jnp.float32) * 0.1,
        "wr": jax.random.normal(ks[4], (d_in, d_in), jnp.float32) * 0.1,
        "br": jax.random.normal(ks[5], (d_in,), jnp.float32) * 0.1,
        "we": jax.random.normal(ks[6], (d_out, 2 * d_in), jnp.float32) * 0.1,
        "be": jax.random.normal(ks[7], (d_out,), jnp.float32) * 0.1,
    }

    node_features = jax.random.normal(ks[8], (B, N, d_in), jnp.float32)
    node_mask = jax.random.uniform(ks[9], (B, N)) > 0.2            # bool (B, N)
    edge_mask = jax.random.uniform(ks[10], (B, N, N)) > 0.2        # bool (B, N, N)

    ref = node_product_reference(node_features, node_mask, edge_mask, params)

    # Exact-parity path (f32 end-to-end).  Tolerance covers fused-weight reassociation and
    # MXU f32 pass-decomposition rounding; real bugs would be orders of magnitude larger.
    out_f32 = jax.block_until_ready(
        node_product(node_features, node_mask, edge_mask, params, out_dtype=jnp.float32))
    assert out_f32.shape == (B, N, N, d_out)
    assert jnp.allclose(out_f32, ref, atol=2e-3, rtol=2e-3), "f32 path mismatch vs reference"

    # Recommended fast path (bf16 output + bf16 stage-2 compute: halves HBM writeback).
    out_bf16 = jax.block_until_ready(
        node_product(node_features, node_mask, edge_mask, params))
    assert out_bf16.dtype == jnp.bfloat16
    assert jnp.allclose(out_bf16.astype(jnp.float32), ref, atol=5e-2, rtol=5e-2), \
        "bf16 path mismatch vs reference"

    print("KERNEL_OK")
</pallas_src>

<mosaic_0001>
module attributes {stable_mosaic.version = 11 : i64} {
  func.func @_proj_kernel(%arg0: i32, %arg1: i32, %arg2: memref<1x32x32xf32, #tpu.memory_space<vmem>>, %arg3: memref<1x32x1xf32, #tpu.memory_space<vmem>>, %arg4: memref<1x32xf32, #tpu.memory_space<vmem>>, %arg5: memref<1x32xf32, #tpu.memory_space<vmem>>, %arg6: memref<32x128xf32, #tpu.memory_space<vmem>>, %arg7: memref<1x128xf32, #tpu.memory_space<vmem>>, %arg8: memref<32x128xf32, #tpu.memory_space<vmem>>, %arg9: memref<1x128xf32, #tpu.memory_space<vmem>>, %arg10: memref<1x128xf32, #tpu.memory_space<vmem>>, %arg11: memref<1x32x128xf32, #tpu.memory_space<vmem>>, %arg12: memref<1x32x128xf32, #tpu.memory_space<vmem>>) attributes {dimension_semantics = [#tpu.dimension_semantics<parallel>, #tpu.dimension_semantics<parallel>], iteration_bounds = array<i64: 2, 1>, scalar_prefetch = 0 : i64, scratch_operands = 0 : i64, tpu.core_type = #tpu.core_type<tc>, window_params = [{transform_indices = @transform_0, window_bounds = array<i64: 1, 32, 32>}, {transform_indices = @transform_1, window_bounds = array<i64: 1, 32, 1>}, {pipeline_mode = #tpu.pipeline_mode<synchronous>, transform_indices = @transform_2, window_bounds = array<i64: 1, 32>}, {pipeline_mode = #tpu.pipeline_mode<synchronous>, transform_indices = @transform_3, window_bounds = array<i64: 1, 32>}, {pipeline_mode = #tpu.pipeline_mode<synchronous>, transform_indices = @transform_4, window_bounds = array<i64: 32, 128>}, {pipeline_mode = #tpu.pipeline_mode<synchronous>, transform_indices = @transform_5, window_bounds = array<i64: 1, 128>}, {pipeline_mode = #tpu.pipeline_mode<synchronous>, transform_indices = @transform_6, window_bounds = array<i64: 32, 128>}, {pipeline_mode = #tpu.pipeline_mode<synchronous>, transform_indices = @transform_7, window_bounds = array<i64: 1, 128>}, {pipeline_mode = #tpu.pipeline_mode<synchronous>, transform_indices = @transform_8, window_bounds = array<i64: 1, 128>}, {transform_indices = @transform_9, window_bounds = array<i64: 1, 32, 128>}, {transform_indices = @transform_10, window_bounds = array<i64: 1, 32, 128>}]} {
    %c0 = arith.constant 0 : index
    %c0_0 = arith.constant 0 : index
    %c0_1 = arith.constant 0 : index
    %0 = vector.load %arg2[%c0, %c0_0, %c0_1] : memref<1x32x32xf32, #tpu.memory_space<vmem>>, vector<1x32x32xf32>
    %1 = vector.shape_cast %0 : vector<1x32x32xf32> to vector<32x32xf32>
    %cst = arith.constant dense<0.000000e+00> : vector<32xf32>
    %2 = vector.multi_reduction <add>, %1, %cst [1] : vector<32x32xf32> to vector<32xf32>
    %3 = vector.shape_cast %2 : vector<32xf32> to vector<32x1xf32>
    %cst_2 = arith.constant 3.200000e+01 : f32
    %4 = vector.broadcast %cst_2 : f32 to vector<32x1xf32>
    %5 = arith.divf %3, %4 : vector<32x1xf32>
    %6 = vector.broadcast %5 : vector<32x1xf32> to vector<32x32xf32>
    %7 = arith.subf %1, %6 : vector<32x32xf32>
    %8 = arith.mulf %7, %7 : vector<32x32xf32>
    %cst_3 = arith.constant dense<0.000000e+00> : vector<32xf32>
    %9 = vector.multi_reduction <add>, %8, %cst_3 [1] : vector<32x32xf32> to vector<32xf32>
    %10 = vector.shape_cast %9 : vector<32xf32> to vector<32x1xf32>
    %cst_4 = arith.constant 3.200000e+01 : f32
    %11 = vector.broadcast %cst_4 : f32 to vector<32x1xf32>
    %12 = arith.divf %10, %11 : vector<32x1xf32>
    %cst_5 = arith.constant 9.99999974E-6 : f32
    %13 = vector.broadcast %cst_5 : f32 to vector<32x1xf32>
    %14 = arith.addf %12, %13 : vector<32x1xf32>
    %15 = math.rsqrt %14 : vector<32x1xf32>
    %16 = vector.broadcast %15 : vector<32x1xf32> to vector<32x32xf32>
    %17 = arith.mulf %7, %16 : vector<32x32xf32>
    %c0_6 = arith.constant 0 : index
    %c0_7 = arith.constant 0 : index
    %18 = vector.load %arg4[%c0_6, %c0_7] : memref<1x32xf32, #tpu.memory_space<vmem>>, vector<1x32xf32>
    %19 = vector.broadcast %18 : vector<1x32xf32> to vector<32x32xf32>
    %20 = arith.mulf %17, %19 : vector<32x32xf32>
    %c0_8 = arith.constant 0 : index
    %c0_9 = arith.constant 0 : index
    %21 = vector.load %arg5[%c0_8, %c0_9] : memref<1x32xf32, #tpu.memory_space<vmem>>, vector<1x32xf32>
    %22 = vector.broadcast %21 : vector<1x32xf32> to vector<32x32xf32>
    %23 = arith.addf %20, %22 : vector<32x32xf32>
    %c0_10 = arith.constant 0 : index
    %c0_11 = arith.constant 0 : index
    %24 = vector.load %arg6[%c0_10, %c0_11] : memref<32x128xf32, #tpu.memory_space<vmem>>, vector<32x128xf32>
    %cst_12 = arith.constant dense<0.000000e+00> : vector<32x128xf32>
    %25 = tpu.matmul %23, %24, %cst_12 {dimension_numbers = #tpu.dot_dimension_numbers<[1], [0], [0], [1], [0, 0, 1, 1], [], []>} : vector<32x32xf32>, vector<32x128xf32>, vector<32x128xf32> -> vector<32x128xf32>
    %c0_13 = arith.constant 0 : index
    %c0_14 = arith.constant 0 : index
    %26 = vector.load %arg7[%c0_13, %c0_14] : memref<1x128xf32, #tpu.memory_space<vmem>>, vector<1x128xf32>
    %27 = vector.broadcast %26 : vector<1x128xf32> to vector<32x128xf32>
    %28 = arith.addf %25, %27 : vector<32x128xf32>
    %c0_15 = arith.constant 0 : index
    %c0_16 = arith.constant 0 : index
    %29 = vector.load %arg8[%c0_15, %c0_16] : memref<32x128xf32, #tpu.memory_space<vmem>>, vector<32x128xf32>
    %cst_17 = arith.constant dense<0.000000e+00> : vector<32x128xf32>
    %30 = tpu.matmul %23, %29, %cst_17 {dimension_numbers = #tpu.dot_dimension_numbers<[1], [0], [0], [1], [0, 0, 1, 1], [], []>} : vector<32x32xf32>, vector<32x128xf32>, vector<32x128xf32> -> vector<32x128xf32>
    %c0_18 = arith.constant 0 : index
    %c0_19 = arith.constant 0 : index
    %31 = vector.load %arg9[%c0_18, %c0_19] : memref<1x128xf32, #tpu.memory_space<vmem>>, vector<1x128xf32>
    %32 = vector.broadcast %31 : vector<1x128xf32> to vector<32x128xf32>
    %33 = arith.addf %30, %32 : vector<32x128xf32>
    %c0_20 = arith.constant 0 : index
    %c0_21 = arith.constant 0 : index
    %c0_22 = arith.constant 0 : index
    %34 = vector.load %arg3[%c0_20, %c0_21, %c0_22] : memref<1x32x1xf32, #tpu.memory_space<vmem>>, vector<1x32x1xf32>
    %35 = vector.shape_cast %34 : vector<1x32x1xf32> to vector<32x1xf32>
    %36 = vector.broadcast %35 : vector<32x1xf32> to vector<32x128xf32>
    %37 = arith.mulf %28, %36 : vector<32x128xf32>
    %c0_23 = arith.constant 0 : index
    %c0_24 = arith.constant 0 : index
    %c0_25 = arith.constant 0 : index
    %38 = vector.load %arg11[%c0_23, %c0_24, %c0_25] : memref<1x32x128xf32, #tpu.memory_space<vmem>>, vector<1x32x128xf32>
    %39 = vector.shape_cast %38 : vector<1x32x128xf32> to vector<32x128xf32>
    %40 = vector.shape_cast %37 : vector<32x128xf32> to vector<1x32x128xf32>
    tpu.vector_store %arg11[%c0_23, %c0_24, %c0_25], %40 {strides = array<i32>} : memref<1x32x128xf32, #tpu.memory_space<vmem>>, vector<1x32x128xf32>,
    %41 = vector.broadcast %35 : vector<32x1xf32> to vector<32x128xf32>
    %42 = arith.mulf %33, %41 : vector<32x128xf32>
    %c0_26 = arith.constant 0 : index
    %c0_27 = arith.constant 0 : index
    %43 = vector.load %arg10[%c0_26, %c0_27] : memref<1x128xf32, #tpu.memory_space<vmem>>, vector<1x128xf32>
    %44 = vector.broadcast %43 : vector<1x128xf32> to vector<32x128xf32>
    %45 = arith.addf %42, %44 : vector<32x128xf32>
    %c0_28 = arith.constant 0 : index
    %c0_29 = arith.constant 0 : index
    %c0_30 = arith.constant 0 : index
    %46 = vector.load %arg12[%c0_28, %c0_29, %c0_30] : memref<1x32x128xf32, #tpu.memory_space<vmem>>, vector<1x32x128xf32>
    %47 = vector.shape_cast %46 : vector<1x32x128xf32> to vector<32x128xf32>
    %48 = vector.shape_cast %45 : vector<32x128xf32> to vector<1x32x128xf32>
    tpu.vector_store %arg12[%c0_28, %c0_29, %c0_30], %48 {strides = array<i32>} : memref<1x32x128xf32, #tpu.memory_space<vmem>>, vector<1x32x128xf32>,
    return
  }
  func.func @transform_0(%arg0: i32, %arg1: i32) -> (i32, i32, i32) {
    %c0_i32 = arith.constant 0 : i32
    %c0_i32_0 = arith.constant 0 : i32
    return %arg0, %arg1, %c0_i32 : i32, i32, i32
  }
  func.func @transform_1(%arg0: i32, %arg1: i32) -> (i32, i32, i32) {
    %c0_i32 = arith.constant 0 : i32
    %c0_i32_0 = arith.constant 0 : i32
    return %arg0, %arg1, %c0_i32 : i32, i32, i32
  }
  func.func @transform_2(%arg0: i32, %arg1: i32) -> (i32, i32) {
    %c0_i32 = arith.constant 0 : i32
    %c0_i32_0 = arith.constant 0 : i32
    %c0_i32_1 = arith.constant 0 : i32
    return %c0_i32, %c0_i32_0 : i32, i32
  }
  func.func @transform_3(%arg0: i32, %arg1: i32) -> (i32, i32) {
    %c0_i32 = arith.constant 0 : i32
    %c0_i32_0 = arith.constant 0 : i32
    %c0_i32_1 = arith.constant 0 : i32
    return %c0_i32, %c0_i32_0 : i32, i32
  }
  func.func @transform_4(%arg0: i32, %arg1: i32) -> (i32, i32) {
    %c0_i32 = arith.constant 0 : i32
    %c0_i32_0 = arith.constant 0 : i32
    %c0_i32_1 = arith.constant 0 : i32
    return %c0_i32, %c0_i32_0 : i32, i32
  }
  func.func @transform_5(%arg0: i32, %arg1: i32) -> (i32, i32) {
    %c0_i32 = arith.constant 0 : i32
    %c0_i32_0 = arith.constant 0 : i32
    %c0_i32_1 = arith.constant 0 : i32
    return %c0_i32, %c0_i32_0 : i32, i32
  }
  func.func @transform_6(%arg0: i32, %arg1: i32) -> (i32, i32) {
    %c0_i32 = arith.constant 0 : i32
    %c0_i32_0 = arith.constant 0 : i32
    %c0_i32_1 = arith.constant 0 : i32
    return %c0_i32, %c0_i32_0 : i32, i32
  }
  func.func @transform_7(%arg0: i32, %arg1: i32) -> (i32, i32) {
    %c0_i32 = arith.constant 0 : i32
    %c0_i32_0 = arith.constant 0 : i32
    %c0_i32_1 = arith.constant 0 : i32
    return %c0_i32, %c0_i32_0 : i32, i32
  }
  func.func @transform_8(%arg0: i32, %arg1: i32) -> (i32, i32) {
    %c0_i32 = arith.constant 0 : i32
    %c0_i32_0 = arith.constant 0 : i32
    %c0_i32_1 = arith.constant 0 : i32
    return %c0_i32, %c0_i32_0 : i32, i32
  }
  func.func @transform_9(%arg0: i32, %arg1: i32) -> (i32, i32, i32) {
    %c0_i32 = arith.constant 0 : i32
    %c0_i32_0 = arith.constant 0 : i32
    return %arg0, %arg1, %c0_i32 : i32, i32, i32
  }
  func.func @transform_10(%arg0: i32, %arg1: i32) -> (i32, i32, i32) {
    %c0_i32 = arith.constant 0 : i32
    %c0_i32_0 = arith.constant 0 : i32
    return %arg0, %arg1, %c0_i32 : i32, i32, i32
  }
}

</mosaic_0001>

<bundles_post_ra>
// kernel: tpu_custom_call.1
= control target key start
LH: loop header
LB: loop body
LE: loop exit
PB: predicated region body
PF: predicated region fallthrough
CT: control target
= control target key end

     0   :  { %16 = vsyncpa [#allocation3], 0  ;;  %s1742_s0 = inlined_call_operand.vmem [shape: f32[2,32,32], index: 0, kind: input, shape index: {}]   ;;  %s1743_s1 = inlined_call_operand.vmem [shape: f32[2,32,1], index: 1, kind: input, shape index: {}]   ;;  %s1744_s2 = inlined_call_operand.vmem [shape: f32[1,32], index: 2, kind: input, shape index: {}]   ;;  %s1745_s3 = inlined_call_operand.vmem [shape: f32[1,32], index: 3, kind: input, shape index: {}]   ;;  %s1746_s4 = inlined_call_operand.hbm [shape: f32[32,128], index: 4, kind: input, shape index: {}]   ;;  %s1747_s5 = inlined_call_operand.vmem [shape: f32[1,128], index: 5, kind: input, shape index: {}]   ;;  %s1748_s6 = inlined_call_operand.hbm [shape: f32[32,128], index: 6, kind: input, shape index: {}]   ;;  %s1749_s7 = inlined_call_operand.vmem [shape: f32[1,128], index: 7, kind: input, shape index: {}]   ;;  %s1750_s8 = inlined_call_operand.vmem [shape: f32[1,128], index: 8, kind: input, shape index: {}]   ;;  %s1751_s9 = inlined_call_operand.hbm [shape: f32[2,32,128], index: 9, kind: output, shape index: {0}]   ;;  %s1752_s10 = inlined_call_operand.hbm [shape: f32[2,32,128], index: 10, kind: output, shape index: {1}]  }
   0x1   :  { %17 = vsyncpa [#allocation6], 0 }
   0x2   :  { %18 = vsyncpa [#allocation4], 0 }
   0x3   :  { %20 = vsyncpa [#allocation4 + $0x1], 0 }
   0x4   :  { %21 = vsyncpa [#allocation9], 0 }
   0x5   :  { %23 = vsyncpa [#allocation9 + $0x1], 0  ;;  %s1433_s13 = smov 0   ;;  %s1435_s14 = smov 0  }
   0x6   :  { %s1437_s15 = smov 0   ;;  %s1439_s16 = smov 0  }
   0x7   :  { %s1441_s17 = smov 0   ;;  %s1443_s18 = smov 0  }
   0x8 LB: > { %1762 = sst [smem:[#allocation14_spill]] %s1347_s13  ;;  %s997_s19 = sadd.s32 4294967295, %s1367_s18   ;;  %s1367_s18 = sphi %s1443_s18, %s29_s18   ;;  %s1363_s17 = sphi %s1441_s17, %s1782_s17   ;;  %s1359_s16 = sphi %s1439_s16, %s1781_s16   ;;  %s1355_s15 = sphi %s1437_s15, %s1780_s15   ;;  %s1351_s14 = sphi %s1435_s14, %s1784_s14   ;;  %s1347_s13 = sphi %s1433_s13, %s1783_s13  }
   0x9   : > { %1763 = sst [smem:[#allocation15_spill]] %s1355_s15  ;;  %s998_s20 = sadd.s32 4294967294, %s1367_s18  }
   0xa   : > { %1764 = sst [smem:[#allocation16_spill]] %s1363_s17  ;;  %s41_s21 = sadd.s32 1, %s1363_s17 }
   0xb   : > { %s253_s22 = sadd.s32 1, %s1355_s15  ;;  %p43_p0 = scmp.ge.s32.totalorder %s41_s21, 2 }
   0xc   : > { %p263_p1 = scmp.ne.s32.totalorder %s1355_s15, %s1351_s14  ;;  %p264_p2 = scmp.eq.s32.totalorder %s997_s19, 1 }
   0xd   : > { %p269_p3 = scmp.ne.s32.totalorder %s1351_s14, %s1347_s13  ;;  %s1786_s21 = smov (%p43_p0, %s41_s21), 0 }
   0xe   : > { %1765 = sst [smem:[#allocation17_spill]] %s1786_s21  ;;  %p1473_p4 = por %p264_p2, %p263_p1 }
   0xf   : > { %p270_p5 = scmp.eq.s32.totalorder %s998_s20, 1  ;;  %s248_s24 = ssub.s32 %s1363_s17, %s1786_s21 }
  0x10   : > { %s1766_s23 = scalar_select %p1473_p4, 1, 0 }
  0x11   : > { %p999_p6 = scmp.ge.s32.totalorder %s1367_s18, 1  ;;  %p251_p7 = scmp.eq.s32.totalorder %s248_s24, 0 }
  0x12   : > { %p1480_p8 = por %p270_p5, %p269_p3  ;;  %p305_p9 = scmp.lt.s32.totalorder %s1367_s18, 3 }
  0x13   : > { %s1486_s26 = scalar_select %p251_p7, %s1355_s15, %s253_s22  }
  0x14   : > { %s1767_s25 = scalar_select %p1480_p8, 1, 0 }
  0x15   : > { %1769 = sst [smem:[#allocation19_spill]] %s1486_s26  ;;  %p1488_p10 = pnand %p999_p6, %p305_p9 }
  0x16   : > { %1768 = sst [smem:[#allocation18_spill]] %s1767_s25  ;;  %p1492_p11 = scmp.eq.s32.totalorder %s997_s19, 0 }
  0x17   : > { %s1770_s27 = scalar_select %p1488_p10, 1, 0 }
  0x18   : > { %s1771_s28 = scalar_select %p1492_p11, 1, 0 }
  0x19   : > { %p1109_p12 = pneg %p1488_p10  ;;  %s1369_s29 = smov [#allocation2]  }
  0x1a   : > { %s323_s30 = sshll.u32 %s1369_s29, 4  ;;  %s1370_s12 = smov [#allocation5]   ;;  %s324_s30 = int_to_ptr.vmem [resolvable:$true] %s323_s30 }
  0x1b   : > { %p1500_p13 = pnand %p1492_p11, %p1109_p12  ;;  %s339_s20 = sshll.u32 %s1370_s12, 4  ;;  %s1504_s20 = int_to_ptr.vmem [resolvable:$true] %s339_s20 }
  0x1c   : > { %s1193_s24 = scalar_lea.hbm %s1746_s4, 512 }
  0x1d   : > { %p1194_p0 = scmp.ne.s32.totalorder %s1746_s4, %s1193_s24  ;;  %p1195_p1 = pneg %p1500_p13 }
  0x1e   : > { %p1200_p5 = scmp.lt.u32.totalorder %s1193_s24, %s1746_s4 }
  0x1f   : > { %p1196_p2 = pnand %p1195_p1, %p1194_p0 }
  0x21   : > { %p1197_p3 = pneg %p1196_p2 }
  0x23   : > { %p1202_p6 = pnand %p1200_p5, %p1197_p3 }
  0x25   : > { %1205 = shalt.err (!%p1202_p6)
}
  0x26   : > { %s1206_s12 = scalar_lea.vmem %s324_s30, 512  ;;  %p1214_p8 = scmp.lt.s32.totalorder %s324_s30, %s324_s30 }
  0x27   : > { %p1207_p7 = scmp.ne.s32.totalorder %s324_s30, %s1206_s12  ;;  %p1215_p4 = scmp.lt.s32.totalorder %s1206_s12, %s1206_s12 }
  0x29   : > { %p1209_p9 = pnand %p1207_p7, %p1195_p1  ;;  %p1216_p11 = por %p1215_p4, %p1214_p8 }
  0x2b   : > { %p1210_p12 = pneg %p1209_p9 }
  0x2d   : > { %p1217_p10 = pnand %p1216_p11, %p1210_p12 }
  0x2f   : > { %1220 = shalt.err (!%p1217_p10)
}
  0x30   : > { %s1371_s17 = smov 128   ;;  %s1372_s21 = smov 8  }
  0x31   : > { %1112 = dma.hbm_to_vmem [thread:$0]  (!%p1500_p13), %s1746_s4, 512, %s324_s30, [#allocation3], %s1371_s17, %s1371_s17, %s1372_s21  }
  0x32   : > { %s1221_s29 = scalar_lea.hbm %s1748_s6, 512 }
  0x33   : > { %p1222_p0 = scmp.ne.s32.totalorder %s1748_s6, %s1221_s29  ;;  %p1228_p10 = scmp.lt.u32.totalorder %s1221_s29, %s1748_s6 }
  0x35   : > { %p1224_p4 = pnand %p1222_p0, %p1195_p1 }
  0x37   : > { %p1225_p8 = pneg %p1224_p4 }
  0x39   : > { %p1230_p11 = pnand %p1228_p10, %p1225_p8 }
  0x3b   : > { %1233 = shalt.err (!%p1230_p11)
}
  0x3c   : > { %s1234_s30 = scalar_lea.vmem %s1504_s20, 512  ;;  %p1242_p6 = scmp.lt.s32.totalorder %s1504_s20, %s1504_s20 }
  0x3d   : > { %p1235_p2 = scmp.ne.s32.totalorder %s1504_s20, %s1234_s30  ;;  %p1243_p7 = scmp.lt.s32.totalorder %s1234_s30, %s1234_s30 }
  0x3f   : > { %p1237_p3 = pnand %p1235_p2, %p1195_p1  ;;  %p1244_p9 = por %p1243_p7, %p1242_p6 }
  0x41   : > { %p1238_p5 = pneg %p1237_p3 }
  0x43   : > { %p1245_p12 = pnand %p1244_p9, %p1238_p5 }
  0x45   : > { %1248 = shalt.err (!%p1245_p12)
}
  0x46   : > { %1115 = dma.hbm_to_vmem [thread:$0]  (!%p1500_p13), %s1748_s6, 512, %s1504_s20, [#allocation6], %s1371_s17, %s1371_s17, %s1372_s21  }
  0x47   : > { %p1773_p0 = scmp.ne.s32.totalorder %s1770_s27, 0 }
  0x48   : > { %p1774_p4 = scmp.ne.s32.totalorder (!%p1773_p0), %s1771_s28, 0 }
  0x49   : > { %387 = sbr.rel (%p1773_p0) target bundleno = 667 (0x29b), region = 56 }
  0x50   : > { %1330 = dma.done.wait (%p1774_p4), [#allocation3], 512  }
  0x51   : > { %1332 = vsyncadd (%p1774_p4), [#allocation3], 4294966784 }
  0x52   : > { %1334 = dma.done.wait (%p1774_p4), [#allocation6], 512  }
  0x53   : > { %1336 = vsyncadd (%p1774_p4), [#allocation6], 4294966784  ;;  %p448_p1 = scmp.lt.s32.totalorder %s1359_s16, 1  ;;  %vm473_vm0 = vcmask 261120   ;;  %v549_v28 = vld [vmem:[#allocation2] sm:$0xff]  ;;  %v550_v29 = vld [vmem:[#allocation2 + $0x8] sm:$0xff] }
  0x54   : > { %v657_v30 = vld [vmem:[#allocation5] sm:$0xff]  ;;  %v1081_v31 = vpack.c.bf16 %v550_v29, %v549_v28  ;;  %v658_v32 = vld [vmem:[#allocation5 + $0x8] sm:$0xff]  ;;  %v551_v33 = vld [vmem:[#allocation2 + $0x10] sm:$0xff]  ;;  %v1373_v40 = vmov 0   ;;  %s1621_s12 = sand.u32 1, %s1351_s14   ;;  %s1035_s21 = sshll.u32 %s1359_s16, 9 }
  0x55   : > { %s1565_s25 = scalar_select %p448_p1, %s1359_s16, 1  ;;  %v552_v34 = vld [vmem:[#allocation2 + $0x18] sm:$0xff]  ;;  %v1089_v35 = vpack.c.bf16 %v658_v32, %v657_v30  ;;  %v659_v37 = vld [vmem:[#allocation5 + $0x10] sm:$0xff]  ;;  %1184 = vset.pattern.permute.xlu1 %v1373_v40  ;;  %1183 = vset.pattern.permute.xlu0 %v1373_v40  ;;  %v1012_v58 = vld [vmem:[%s1744_s2] ss:$0 sm:$0xff] }
  0x56   : > { %v1085_v36 = vpack.c.bf16 %v552_v34, %v551_v33  ;;  %1082 = vmatprep.subr.bf16.mxu0 %v1081_v31  ;;  %v660_v38 = vld [vmem:[#allocation5 + $0x18] sm:$0xff]  ;;  %v1013_v60 = vld [vmem:[%s1745_s3] ss:$0 sm:$0xff]  ;;  %s1653_s24 = scalar_lea.hbm %s1751_s9, %s1035_s21  ;;  %s1662_s13 = scalar_lea.hbm %s1752_s10, %s1035_s21 }
  0x57   : > { %s1033_s27 = sshll.u32 %s1565_s25, 5  ;;  %1090 = vmatprep.subr.bf16.mxu1 %v1089_v35  ;;  %1084 = vmatpush3.bf16.msra.mxu0 %v1081_v31  ;;  %v1093_v39 = vpack.c.bf16 %v660_v38, %v659_v37  ;;  %s805_s15 = scalar_lea.sflag [#allocation4], %s1621_s12 }
  0x58   : > { %s455_s17 = scalar_lea.vmem %s1742_s0, %s1033_s27  ;;  %1092 = vmatpush3.bf16.msra.mxu1 %v1089_v35  ;;  %1086 = vmatprep.subr.bf16.mxu0 %v1085_v36  ;;  %s465_s26 = scalar_lea.vmem %s1743_s1, %s1033_s27 }
  0x59   : > { %v469_v0 = vld [vmem:[%s455_s17] sm:$0xff]  ;;  %v471_v1 = vld [vmem:[%s455_s17 + $0x10] sm:$0xff]  ;;  %v470_v2 = vld [vmem:[%s455_s17 + $0x8] sm:$0xff]  ;;  %1094 = vmatprep.subr.bf16.mxu1 %v1093_v39  ;;  %s1006_s27 = sshll.u32 %s1621_s12, 5  ;;  %p1775_p8 = scmp.ne.s32.totalorder %s1766_s23, 0 }
  0x5a   : > { %v474_v3 = vsel %vm473_vm0, %v469_v0, 0.0  ;;  %v480_v4 = vsel %vm473_vm0, %v471_v1, 0.0  ;;  %v472_v5 = vld [vmem:[%s455_s17 + $0x18] sm:$0xff]  ;;  %v477_v6 = vsel %vm473_vm0, %v470_v2, 0.0  ;;  %v754_v41 = vld [vmem:[%s465_s26 + $0x8] sm:$0xff]  ;;  %v753_v42 = vld [vmem:[%s465_s26] sm:$0xff] }
  0x5b   : > { %475 = vadd.xlane.f32.xlu0 %v474_v3  ;;  %481 = vadd.xlane.f32.xlu1 %v480_v4  ;;  %v483_v7 = vsel %vm473_vm0, %v472_v5, 0.0  ;;  %v755_v43 = vld [vmem:[%s465_s26 + $0x10] sm:$0xff]  ;;  %v756_v44 = vld [vmem:[%s465_s26 + $0x18] sm:$0xff]  ;;  %s1635_s17 = scalar_lea.vmem [#allocation7], %s1006_s27  ;;  %s1645_s26 = scalar_lea.vmem [#allocation8], %s1006_s27 }
  0x5c   : > { %1088 = vmatpush3.bf16.msra.mxu0 %v1085_v36  ;;  %1096 = vmatpush3.bf16.msra.mxu1 %v1093_v39  ;;  %s825_s28 = sshll.u32 %s1635_s17, 4  ;;  %s843_s16 = sshll.u32 %s1645_s26, 4  ;;  %s1640_s28 = int_to_ptr.vmem [resolvable:$true] %s825_s28  ;;  %s1656_s16 = int_to_ptr.vmem [resolvable:$true] %s843_s16 }
  0x5d   : > { %s1249_s25 = scalar_lea.vmem %s1640_s28, 512  ;;  %s1374_s27 = smov [#allocation7]  }
  0x5e   : > { %p1250_p13 = scmp.ne.s32.totalorder %s1640_s28, %s1249_s25  ;;  %s1253_s11 = sshll.u32 %s1374_s27, 4  ;;  %s1254_s11 = int_to_ptr.vmem [resolvable:$false] %s1253_s11 }
  0x5f   : > { %478 = vadd.xlane.f32.xlu0 %v477_v6  ;;  %484 = vadd.xlane.f32.xlu1 %v483_v7  ;;  %s1255_s20 = scalar_lea.vmem %s1254_s11, 1024  ;;  %p1256_p2 = scmp.lt.s32.totalorder %s1640_s28, %s1254_s11 }
  0x60   : > { %p1251_p10 = pnand %p1250_p13, %p1775_p8  ;;  %p1257_p3 = scmp.lt.s32.totalorder %s1255_s20, %s1249_s25 }
  0x62   : > { %p1252_p11 = pneg %p1251_p10  ;;  %p1258_p5 = por %p1257_p3, %p1256_p2 }
  0x64   : > { %p1259_p6 = pnand %p1258_p5, %p1252_p11 }
  0xe8   : > { %v476_v8 = vpop.xlane.xlu0 %475  ;;  %v482_v9 = vpop.xlane.xlu1 %481 }
  0xe9   : > { %v487_v10 = vmul.f32 0.03125, %v476_v8  ;;  %v489_v11 = vmul.f32 0.03125, %v482_v9 }
  0xeb   : > { %v1577_v12 = vsub.f32 %v469_v0, %v487_v10  ;;  %v1579_v13 = vsub.f32 %v471_v1, %v489_v11 }
  0xec   : > { %v479_v14 = vpop.xlane.xlu0 %478  ;;  %v485_v15 = vpop.xlane.xlu1 %484 }
  0xed   : > { %v488_v16 = vmul.f32 0.03125, %v479_v14  ;;  %v490_v17 = vmul.f32 0.03125, %v485_v15  ;;  %v495_v18 = vmul.f32 %v1577_v12, %v1577_v12  ;;  %v497_v19 = vmul.f32 %v1579_v13, %v1579_v13 }
  0xef   : > { %v1585_v20 = vsub.f32 %v470_v2, %v488_v16  ;;  %v1587_v21 = vsub.f32 %v472_v5, %v490_v17  ;;  %v499_v22 = vsel %vm473_vm0, %v495_v18, 0.0  ;;  %v505_v23 = vsel %vm473_vm0, %v497_v19, 0.0 }
  0xf0   : > { %500 = vadd.xlane.f32.xlu0 %v499_v22  ;;  %v1024_v22 = vld [vmem:[%s1750_s8] ss:$0 sm:$0xff] }
  0xf1   : > { %v496_v24 = vmul.f32 %v1585_v20, %v1585_v20  ;;  %v498_v25 = vmul.f32 %v1587_v21, %v1587_v21 }
  0xf3   : > { %v502_v26 = vsel %vm473_vm0, %v496_v24, 0.0  ;;  %v508_v27 = vsel %vm473_vm0, %v498_v25, 0.0 }
  0xf4   : > { %506 = vadd.xlane.f32.xlu0 %v505_v23  ;;  %503 = vadd.xlane.f32.xlu1 %v502_v26 }
  0xf8   : > { %509 = vadd.xlane.f32.xlu1 %v508_v27 }
 0x109   : > { %764 = vperm.xlu1 %1184, %v754_v41  }
 0x10a   : > { %759 = vperm.xlu0 %1183, %v753_v42  }
 0x10d   : > { %769 = vperm.xlu1 %1184, %v755_v43  }
 0x111   : > { %774 = vperm.xlu1 %1184, %v756_v44  }
 0x17d   : > { %v501_v45 = vpop.xlane.xlu0 %500 }
 0x17e   : > { %v511_v46 = vmul.f32 0.03125, %v501_v45 }
 0x180   : > { %v515_v47 = vadd.f32 1e-05, %v511_v46 }
 0x181   : > { %v504_v48 = vpop.xlane.xlu1 %503  ;;  %v507_v49 = vpop.xlane.xlu0 %506 }
 0x182   : > { %1185 = vrsqrt.f32 %v515_v47  ;;  %v512_v50 = vmul.f32 0.03125, %v504_v48  ;;  %v513_v51 = vmul.f32 0.03125, %v507_v49 }
 0x184   : > { %v516_v52 = vadd.f32 1e-05, %v512_v50  ;;  %v517_v53 = vadd.f32 1e-05, %v513_v51 }
 0x185   : > { %v510_v54 = vpop.xlane.xlu1 %509 }
 0x186   : > { %1187 = vrsqrt.f32 %v516_v52  ;;  %v514_v55 = vmul.f32 0.03125, %v510_v54 }
 0x187   : > { %1189 = vrsqrt.f32 %v517_v53 }
 0x188   : > { %v518_v56 = vadd.f32 1e-05, %v514_v55 }
 0x189   : > { %v765_v11 = vpop.permute.xlu1 %764  ;;  %v760_v15 = vpop.permute.xlu0 %759 }
 0x18a   : > { %1191 = vrsqrt.f32 %v518_v56 }
 0x18c   : > { %v1186_v57 = vpop.eup %1185 }
 0x18d   : > { %v523_v59 = vmul.f32 %v1186_v57, %v1577_v12  ;;  %v1014_v12 = vld [vmem:[%s1747_s5] ss:$0 sm:$0xff]  ;;  %v770_v14 = vpop.permute.xlu1 %769 }
 0x18f   : > { %v534_v61 = vmul.f32 %v1012_v58, %v523_v59 }
 0x190   : > { %v1188_v62 = vpop.eup %1187 }
 0x191   : > { %v1190_v63 = vpop.eup %1189  ;;  %v545_v0 = vadd.f32 %v1013_v60, %v534_v61  ;;  %v524_v1 = vmul.f32 %v1188_v62, %v1585_v20  ;;  %v775_v36 = vpop.permute.xlu1 %774 }
 0x192   : > { %v525_v2 = vmul.f32 %v1190_v63, %v1579_v13  ;;  %v1019_v13 = vld [vmem:[%s1749_s7] ss:$0 sm:$0xff] }
 0x193   : > { %1061 = vmatprep.mubr.msk.f32.mxu0 %vm473_vm0, %v545_v0  ;;  %1075 = vmatprep.mubr.msk.f32.mxu1 %vm473_vm0, %v545_v0  ;;  %v535_v3 = vmul.f32 %v1012_v58, %v524_v1 }
 0x194   : > { %v1192_v4 = vpop.eup %1191  ;;  %v536_v5 = vmul.f32 %v1012_v58, %v525_v2 }
 0x195   : > { %v546_v6 = vadd.f32 %v1013_v60, %v535_v3  ;;  %v526_v7 = vmul.f32 %v1192_v4, %v1587_v21 }
 0x196   : > { %v547_v8 = vadd.f32 %v1013_v60, %v536_v5 }
 0x197   : > { %1062 = vmatmul.mubr.msk.f32.vlgmr.msra.gmra.mrb[0].mxu0 %vm473_vm0, %v546_v6  ;;  %1076 = vmatmul.mubr.msk.f32.vlgmr.msra.gmra.mrb[0].mxu1 %vm473_vm0, %v546_v6  ;;  %v537_v9 = vmul.f32 %v1012_v58, %v526_v7 }
 0x198   : > { %1064 = vmatprep.mubr.msk.f32.mxu0 %vm473_vm0, %v547_v8  ;;  %1078 = vmatprep.mubr.msk.f32.mxu1 %vm473_vm0, %v547_v8 }
 0x199   : > { %v548_v10 = vadd.f32 %v1013_v60, %v537_v9 }
 0x19b   : > { %1065 = vmatmul.mubr.msk.f32.gmra.mrb[2].mxu0 %vm473_vm0, %v548_v10  ;;  %1079 = vmatmul.mubr.msk.f32.gmra.mrb[2].mxu1 %vm473_vm0, %v548_v10 }
 0x26a   : > { %v1063_v16 = vpop.f32.mrb[0].mxu0  ;;  %v1077_v17 = vpop.f32.mrb[0].mxu1 }
 0x26b   : > { %v644_v18 = vadd.f32 %v1063_v16, %v1014_v12  ;;  %v740_v19 = vadd.f32 %v1077_v17, %v1019_v13  ;;  %v638_v20 = vpop.f32.mrb[1].mxu0  ;;  %v734_v21 = vpop.f32.mrb[1].mxu1 }
 0x26c   : > { %v639_v23 = vadd.f32 %v1014_v12, %v638_v20  ;;  %v735_v24 = vadd.f32 %v1019_v13, %v734_v21 }
 0x26d   : > { %v778_v25 = vmul.f32 %v765_v11, %v644_v18  ;;  %v786_v26 = vmul.f32 %v765_v11, %v740_v19 }
 0x26e   : > { %v777_v27 = vmul.f32 %v760_v15, %v639_v23  ;;  %v785_v28 = vmul.f32 %v760_v15, %v735_v24  ;;  %v1066_v29 = vpop.f32.mrb[2].mxu0  ;;  %v1080_v30 = vpop.f32.mrb[2].mxu1 }
 0x26f   : > { %782 = vst [vmem:[%s1635_s17 + $0x8] sm:$0xff] %v778_v25  ;;  %v797_v31 = vadd.f32 %v1024_v22, %v786_v26  ;;  %v654_v32 = vadd.f32 %v1066_v29, %v1014_v12  ;;  %v750_v33 = vadd.f32 %v1080_v30, %v1019_v13  ;;  %v648_v34 = vpop.f32.mrb[3].mxu0  ;;  %v744_v35 = vpop.f32.mrb[3].mxu1 }
 0x270   : > { %781 = vst [vmem:[%s1635_s17] sm:$0xff] %v777_v27  ;;  %v796_v37 = vadd.f32 %v1024_v22, %v785_v28  ;;  %v649_v38 = vadd.f32 %v1014_v12, %v648_v34  ;;  %v745_v39 = vadd.f32 %v1019_v13, %v744_v35 }
 0x271   : > { %801 = vst [vmem:[%s1645_s26 + $0x8] sm:$0xff] %v797_v31  ;;  %v780_v40 = vmul.f32 %v775_v36, %v654_v32  ;;  %v788_v41 = vmul.f32 %v775_v36, %v750_v33 }
 0x272   : > { %800 = vst [vmem:[%s1645_s26] sm:$0xff] %v796_v37  ;;  %v779_v42 = vmul.f32 %v770_v14, %v649_v38  ;;  %v787_v43 = vmul.f32 %v770_v14, %v745_v39 }
 0x273   : > { %784 = vst [vmem:[%s1635_s17 + $0x18] sm:$0xff] %v780_v40  ;;  %v799_v44 = vadd.f32 %v1024_v22, %v788_v41 }
 0x274   : > { %783 = vst [vmem:[%s1635_s17 + $0x10] sm:$0xff] %v779_v42  ;;  %v798_v45 = vadd.f32 %v1024_v22, %v787_v43 }
 0x275   : > { %803 = vst [vmem:[%s1645_s26 + $0x18] sm:$0xff] %v799_v44 }
 0x276   : > { %1262 = shalt.err (!%p1259_p6)
}
 0x277   : > { %s1263_s17 = scalar_lea.hbm %s1653_s24, 512  ;;  %s1267_s22 = scalar_lea.hbm %s1751_s9, 1024 }
 0x278   : > { %p1264_p7 = scmp.ne.s32.totalorder %s1653_s24, %s1263_s17  ;;  %p1268_p0 = scmp.lt.u32.totalorder %s1653_s24, %s1751_s9 }
 0x279   : > { %p1269_p4 = scmp.lt.u32.totalorder %s1267_s22, %s1263_s17  ;;  %p1271_p13 = scmp.lt.u32.totalorder %s1263_s17, %s1653_s24 }
 0x27a   : > { %p1265_p9 = pnand %p1264_p7, %p1775_p8 }
 0x27b   : > { %p1270_p1 = por %p1269_p4, %p1268_p0 }
 0x27c   : > { %p1266_p12 = pneg %p1265_p9 }
 0x27d   : > { %p1272_p10 = por %p1271_p13, %p1270_p1 }
 0x27f   : > { %p1273_p11 = pnand %p1272_p10, %p1266_p12 }
 0x281   : > { %1276 = shalt.err (!%p1273_p11)
}
 0x282   : > { %s1375_s25 = smov 128   ;;  %s1376_s27 = smov 8   ;;  %802 = vst [vmem:[%s1645_s26 + $0x10] sm:$0xff] %v798_v45 }
 0x283   : > { %1105 = dma.vmem_to_hbm [thread:$0]  (%p1775_p8), %s1640_s28, 512, %s1653_s24, %s805_s15, %s1375_s25, %s1375_s25, %s1376_s27  }
 0x284   : > { %s810_s11 = scalar_lea.sflag [#allocation9], %s1621_s12  ;;  %s1277_s20 = scalar_lea.vmem %s1656_s16, 512 }
 0x285   : > { %p1278_p2 = scmp.ne.s32.totalorder %s1656_s16, %s1277_s20  ;;  %s1377_s17 = smov [#allocation8]  }
 0x286   : > { %s1281_s21 = sshll.u32 %s1377_s17, 4  ;;  %s1282_s21 = int_to_ptr.vmem [resolvable:$false] %s1281_s21 }
 0x287   : > { %p1279_p3 = pnand %p1278_p2, %p1775_p8  ;;  %s1283_s19 = scalar_lea.vmem %s1282_s21, 1024 }
 0x288   : > { %p1284_p6 = scmp.lt.s32.totalorder %s1656_s16, %s1282_s21  ;;  %p1285_p7 = scmp.lt.s32.totalorder %s1283_s19, %s1277_s20 }
 0x289   : > { %p1280_p5 = pneg %p1279_p3 }
 0x28a   : > { %p1286_p9 = por %p1285_p7, %p1284_p6 }
 0x28c   : > { %p1287_p12 = pnand %p1286_p9, %p1280_p5 }
 0x28e   : > { %1290 = shalt.err (!%p1287_p12)
}
 0x28f   : > { %s1291_s28 = scalar_lea.hbm %s1662_s13, 512  ;;  %s1295_s15 = scalar_lea.hbm %s1752_s10, 1024 }
 0x290   : > { %p1292_p0 = scmp.ne.s32.totalorder %s1662_s13, %s1291_s28  ;;  %p1296_p13 = scmp.lt.u32.totalorder %s1662_s13, %s1752_s10 }
 0x291   : > { %p1297_p10 = scmp.lt.u32.totalorder %s1295_s15, %s1291_s28  ;;  %p1299_p2 = scmp.lt.u32.totalorder %s1291_s28, %s1662_s13 }
 0x292   : > { %p1293_p4 = pnand %p1292_p0, %p1775_p8 }
 0x293   : > { %p1298_p11 = por %p1297_p10, %p1296_p13 }
 0x294   : > { %p1294_p1 = pneg %p1293_p4 }
 0x295   : > { %p1300_p3 = por %p1299_p2, %p1298_p11 }
 0x297   : > { %p1301_p5 = pnand %p1300_p3, %p1294_p1 }
 0x299   : > { %1304 = shalt.err (!%p1301_p5)
}
 0x29a   : > { %1106 = dma.vmem_to_hbm [thread:$0]  (%p1775_p8), %s1656_s16, 512, %s1662_s13, %s810_s11, %s1375_s25, %s1375_s25, %s1376_s27  }
 0x29b PF: > { %s1776_s30 = sld [smem:[#allocation14_spill]]  ;;  %s1777_s20 = sld [smem:[#allocation18_spill]] }
 0x29c   : > { %p1127_p6 = scmp.ge.s32.totalorder %s1367_s18, 2 }
 0x2a1   : > { %s858_s17 = sand.u32 1, %s1776_s30   ;;  %p1778_p7 = scmp.ne.s32.totalorder %s1777_s20, 0 }
 0x2a2   : > { %s859_s21 = scalar_lea.sflag [#allocation4], %s858_s17 }
 0x2a3   : > { %p1117_p9 = pnand %p1127_p6, %p1778_p7 }
 0x2a5   : > { %1338 = dma.done.wait (!%p1117_p9), %s859_s21, 512  }
 0x2a6   : > { %1340 = vsyncadd (!%p1117_p9), %s859_s21, 4294966784  ;;  %s868_s23 = scalar_lea.sflag [#allocation9], %s858_s17 }
 0x2a7   : > { %1342 = dma.done.wait (!%p1117_p9), %s868_s23, 512  }
 0x2a8   : > { %1344 = vsyncadd (!%p1117_p9), %s868_s23, 4294966784  ;;  %s29_s18 = sadd.s32 1, %s1367_s18   ;;  %s1779_s12 = sld [smem:[#allocation15_spill]] }
 0x2a9   : > { %p26_p12 = scmp.ge.s32.totalorder %s29_s18, 4   ;;  %s1780_s15 = sld [smem:[#allocation19_spill]] }
 0x2aa   : > { %s1781_s16 = sld [smem:[#allocation16_spill]]  ;;  %s1782_s17 = sld [smem:[#allocation17_spill]] }
 0x2ab   : > { %s1783_s13 = smov %s1351_s14  ;;  %28 = sbr.rel (!%p26_p12) target bundleno = 8 (0x8), region = 120 }
 0x2ae   : > { %s1784_s14 = smov %s1779_s12 }
 0x2b2   :  { %873 = vsyncpa [#allocation3], 1 }
 0x2b3   :  { %875 = vsyncpa [#allocation3 + $0x1], 1 }
 0x2b4   :  { %876 = vsyncpa [#allocation6], 1 }
 0x2b5   :  { %877 = vsyncpa [#allocation4], 1 }
 0x2b6   :  { %879 = vsyncpa [#allocation4 + $0x1], 1 }
 0x2b7   :  { %880 = vsyncpa [#allocation9], 1 }
 0x2b8   :  { %882 = vsyncpa [#allocation9 + $0x1], 1 }

</bundles_post_ra>
